<compile_context>
chip_gen: v5e
topology: v5e:2x2
jax: 0.10.0
libtpu: 0.0.40
codegen_flags: <defaults>
</compile_context>

<pallas_src>
import functools
import numpy as np
import jax
import jax.numpy as jnp
from jax.experimental import pallas as pl
from jax.experimental.pallas import tpu as pltpu


def _round_up(x, m):
    return ((x + m - 1) // m) * m


def _cpad(c):
    # bf16 sublane tile is 16 rows -> pad channel counts to a multiple of 16
    return _round_up(max(int(c), 1), 16)


# ---------------------------------------------------------------------------
# Generation-aware VMEM budgeting (v5e/v6e: 128 MiB, v7x: 64 MiB).
# ---------------------------------------------------------------------------
def _tpu_vmem_capacity():
    try:
        return int(pltpu.get_tpu_info().vmem_capacity_bytes)
    except Exception:
        return 64 << 20          # conservative (v7x-sized) default


_VMEM_CAP = _tpu_vmem_capacity()
if _VMEM_CAP >= (96 << 20):      # v5e / v6e class parts (128 MiB VMEM)
    _FUSED_SPATIAL_LIMIT = 32768     # padded flattened plane lanes
    _VMEM_LIMIT_BYTES = 100 << 20
else:                            # v7x class parts (64 MiB VMEM)
    _FUSED_SPATIAL_LIMIT = 16384
    _VMEM_LIMIT_BYTES = 48 << 20


def _plane_tile(n_planes, plane_elems):
    """How many planes a DWT/IDWT grid step processes."""
    per_plane_bytes = 6 * plane_elems * 4          # in + out + temps, f32
    p = max(1, min(8, _VMEM_LIMIT_BYTES // (2 * per_plane_bytes)))
    if n_planes >= 2:
        p = min(p, (n_planes + 1) // 2)            # keep >=2 steps (megacore)
    return max(1, min(p, n_planes))


# ---------------------------------------------------------------------------
# Generic M-tiled matmul kernel: Y = [relu](X @ W + b) [+ residual]
# (fallback conv path for large planes; bf16 inputs, f32 accumulation,
#  lane-dense N padded to 128, grid over M marked "parallel")
# ---------------------------------------------------------------------------
def _mm_kernel(x_ref, w_ref, b_ref, *rest, relu, has_res):
    if has_res:
        res_ref, o_ref = rest
    else:
        (o_ref,) = rest
    acc = jnp.dot(x_ref[...], w_ref[...], preferred_element_type=jnp.float32)
    acc = acc + b_ref[...]
    if relu:
        acc = jnp.maximum(acc, 0.0)
    if has_res:
        acc = acc + res_ref[...].astype(jnp.float32)
    o_ref[...] = acc.astype(o_ref.dtype)


def pallas_matmul(x, w, b=None, relu=False, residual=None):
    M, K = x.shape
    K2, N = w.shape
    assert K == K2
    Npad = _round_up(N, 128)
    TM = 1024 if M > 1024 else _round_up(M, 16)    # bigger M tiles (less step overhead)
    Mpad = _round_up(M, TM)

    xb = jnp.pad(x.astype(jnp.bfloat16), ((0, Mpad - M), (0, 0)))
    wb = jnp.pad(w.astype(jnp.bfloat16), ((0, 0), (0, Npad - N)))
    bb = jnp.zeros((1, Npad), jnp.float32)
    if b is not None:
        bb = bb.at[0, :N].set(b.astype(jnp.float32))

    has_res = residual is not None
    args = [xb, wb, bb]
    in_specs = [
        pl.BlockSpec((TM, K), lambda i: (i, 0)),
        pl.BlockSpec((K, Npad), lambda i: (0, 0)),
        pl.BlockSpec((1, Npad), lambda i: (0, 0)),
    ]
    if has_res:
        rp = jnp.pad(residual.astype(jnp.bfloat16),      # bf16 residual: halve HBM bytes
                     ((0, Mpad - M), (0, Npad - N)))
        args.append(rp)
        in_specs.append(pl.BlockSpec((TM, Npad), lambda i: (i, 0)))

    out = pl.pallas_call(
        functools.partial(_mm_kernel, relu=relu, has_res=has_res),
        out_shape=jax.ShapeDtypeStruct((Mpad, Npad), jnp.float32),
        grid=(Mpad // TM,),
        in_specs=in_specs,
        out_specs=pl.BlockSpec((TM, Npad), lambda i: (i, 0)),
        compiler_params=pltpu.CompilerParams(
            dimension_semantics=("parallel",)),
    )(*args)
    return out[:M, :N]


def conv3x3(x, w, b, relu=False, residual=None):
    # Fallback 3x3 "same" conv via im2col + tiled Pallas matmul (NCHW).
    B, C, H, W = x.shape
    Cout = w.shape[0]
    xp = jnp.pad(x, ((0, 0), (0, 0), (1, 1), (1, 1)))
    cols = jnp.stack([xp[:, :, ky:ky + H, kx:kx + W]
                      for ky in range(3) for kx in range(3)], axis=0)
    cols = jnp.transpose(cols, (1, 3, 4, 0, 2)).reshape(B * H * W, 9 * C)
    wmat = jnp.transpose(w, (2, 3, 1, 0)).reshape(9 * C, Cout)
    res = None
    if residual is not None:
        res = jnp.transpose(residual, (0, 2, 3, 1)).reshape(B * H * W, Cout)
    out = pallas_matmul(cols, wmat, b, relu=relu, residual=res)
    return jnp.transpose(out.reshape(B, H, W, Cout), (0, 3, 1, 2))


# ---------------------------------------------------------------------------
# Fused conv-stack kernel (one pallas_call per SubNet_4layers / Res).
# Channels on sublanes (padded to 16), zero-padded flattened spatial plane on
# lanes (padded to a 128 multiple).  One MXU matmul per layer with K = 9*cin.
# ---------------------------------------------------------------------------
def _convstack_kernel(*refs, layer_dims, w_pitch, s_len, add_residual):
    n_layers = len(layer_dims)
    x_ref, mask_ref = refs[0], refs[1]
    layer_refs = refs[2:2 + 2 * n_layers]
    o_ref = refs[2 + 2 * n_layers]
    pbuf = refs[2 + 2 * n_layers + 1]            # (C_max, Sp + 2*pad) bf16 scratch

    pad = w_pitch + 1
    cmax = pbuf.shape[0]
    mask = mask_ref[...]                         # (1, Sp) f32

    # Zero the halo columns once per grid step so shifted reads at the plane
    # borders see zeros (scratch contents are otherwise undefined).
    zero_halo = jnp.zeros((cmax, pad), jnp.bfloat16)
    pbuf[pl.ds(0, cmax), pl.ds(0, pad)] = zero_halo
    pbuf[pl.ds(0, cmax), pl.ds(pad + s_len, pad)] = zero_halo

    # Layer-0 input: write the (already channel/spatial padded) plane into the
    # buffer centre; no long-lived f32 copy is kept around.
    c0p = layer_dims[0][0]
    pbuf[pl.ds(0, c0p), pl.ds(pad, s_len)] = x_ref[0].astype(jnp.bfloat16)

    acc = None
    act = None
    for l, (cin_p, cout_p) in enumerate(layer_dims):
        w_ref = layer_refs[2 * l]                # (cout_p, 9*cin_p) bf16
        b_ref = layer_refs[2 * l + 1]            # (cout_p, 1)       f32
        if l > 0:
            pbuf[pl.ds(0, cin_p), pl.ds(pad, s_len)] = act

        # Gather the 9 shifted slices and stack them along K (sublane) axis.
        taps = []
        for k in range(9):
            ky, kx = k // 3, k % 3
            d = (ky - 1) * w_pitch + (kx - 1)
            taps.append(pbuf[pl.ds(0, cin_p), pl.ds(pad + d, s_len)])
        stacked = jnp.concatenate(taps, axis=0)  # (9*cin_p, Sp) bf16

        acc = jnp.dot(w_ref[...], stacked,
                      preferred_element_type=jnp.float32) + b_ref[...]
        if l < n_layers - 1:
            # ReLU + re-zero border ring / lane tail (zero-pad semantics for
            # the next conv).
            act = (jnp.maximum(acc, 0.0) * mask).astype(jnp.bfloat16)

    if add_residual:
        acc = acc + x_ref[0]                     # re-read input ref (f32)
    o_ref[0] = acc.astype(o_ref.dtype)


def _pack_weight3x3(w, cin_p, cout_p):
    # (cout, cin, 3, 3) -> (cout_p, 9*cin_p), columns ordered tap-major so the
    # kernel's concat order matches:  col = k*cin_p + c,  k = 3*ky + kx.
    cout, cin = int(w.shape[0]), int(w.shape[1])
    wt = jnp.transpose(w, (2, 3, 0, 1)).reshape(9, cout, cin).astype(jnp.float32)
    wp = jnp.zeros((9, cout_p, cin_p), jnp.float32).at[:, :cout, :cin].set(wt)
    return jnp.transpose(wp, (1, 0, 2)).reshape(cout_p, 9 * cin_p).astype(jnp.bfloat16)


def _conv_stack_fused(x, layer_params, add_residual):
    # x: (B, C0, H, W).  layer_params: [(w (Cout,Cin,3,3), b (Cout,)), ...]
    B, C0, H, W = x.shape
    Hp, Wp = H + 2, W + 2
    S = Hp * Wp
    Sp = _round_up(S, 128)
    pad = Wp + 1

    layer_dims = []
    for (w, _) in layer_params:
        layer_dims.append((_cpad(w.shape[1]), _cpad(w.shape[0])))
    c0p = layer_dims[0][0]
    c_last = int(layer_params[-1][0].shape[0])
    c_last_p = layer_dims[-1][1]
    cmax = max(max(ci, co) for (ci, co) in layer_dims)
    if add_residual:
        assert c0p == c_last_p, "residual needs matching (padded) channel count"

    # Input: zero channel padding, 1-px spatial ring, flatten, pad lanes.
    xp = jnp.pad(x, ((0, 0), (0, c0p - C0), (1, 1), (1, 1))).reshape(B, c0p, S)
    xp = jnp.pad(xp, ((0, 0), (0, 0), (0, Sp - S))).astype(jnp.float32)

    m2 = np.zeros((Hp, Wp), np.float32)
    m2[1:-1, 1:-1] = 1.0
    mask_np = np.zeros((1, Sp), np.float32)
    mask_np[0, :S] = m2.reshape(-1)
    mask = jnp.asarray(mask_np)

    args = [xp, mask]
    in_specs = [
        pl.BlockSpec((1, c0p, Sp), lambda b: (b, 0, 0)),
        pl.BlockSpec((1, Sp), lambda b: (0, 0)),
    ]
    for (w, bias), (cip, cop) in zip(layer_params, layer_dims):
        co = int(w.shape[0])
        wpk = _pack_weight3x3(w, cip, cop)
        bpk = jnp.zeros((cop, 1), jnp.float32).at[:co, 0].set(
            bias.astype(jnp.float32))
        args += [wpk, bpk]
        in_specs += [
            pl.BlockSpec((cop, 9 * cip), lambda b: (0, 0)),
            pl.BlockSpec((cop, 1), lambda b: (0, 0)),
        ]

    out = pl.pallas_call(
        functools.partial(_convstack_kernel, layer_dims=tuple(layer_dims),
                          w_pitch=Wp, s_len=Sp, add_residual=add_residual),
        out_shape=jax.ShapeDtypeStruct((B, c_last_p, Sp), jnp.float32),
        grid=(B,),
        in_specs=in_specs,
        out_specs=pl.BlockSpec((1, c_last_p, Sp), lambda b: (b, 0, 0)),
        scratch_shapes=[pltpu.VMEM((cmax, Sp + 2 * pad), jnp.bfloat16)],
        compiler_params=pltpu.CompilerParams(
            dimension_semantics=("parallel",),
            vmem_limit_bytes=_VMEM_LIMIT_BYTES),
    )(*args)
    out = out[:, :c_last, :S].reshape(B, c_last, Hp, Wp)[:, :, 1:-1, 1:-1]
    return out


def _apply_conv_stack(layer_params, x, add_residual=True):
    _, _, H, W = x.shape
    if _round_up((H + 2) * (W + 2), 128) <= _FUSED_SPATIAL_LIMIT:
        return _conv_stack_fused(x, layer_params, add_residual)
    # Fallback for large planes (scales; M-tiled, double-buffered).
    h = x
    n = len(layer_params)
    for l, (w, b) in enumerate(layer_params):
        last = l == n - 1
        h = conv3x3(h, w, b, relu=not last,
                    residual=x if (last and add_residual) else None)
    return h


def subnet44_apply(p, x):          # SubNet_4layers(3, 3, 24); returns subnet(x)+x
    layers = [(p["w1"], p["b1"]), (p["w2"], p["b2"]),
              (p["w3"], p["b3"]), (p["w4"], p["b4"])]
    return _apply_conv_stack(layers, x, add_residual=True)


def res9_apply(p, x):              # Res(9, 9); returns res(x)+x
    layers = [(p["w1"], p["b1"]), (p["w2"], p["b2"])]
    return _apply_conv_stack(layers, x, add_residual=True)


def _conv_stack_ref(layer_params, x, add_residual=True):
    # Pure-JAX f32 reference (used only by the self-test).
    h = x
    n = len(layer_params)
    for l, (w, b) in enumerate(layer_params):
        h = jax.lax.conv_general_dilated(
            h, w, (1, 1), ((1, 1), (1, 1)),
            dimension_numbers=("NCHW", "OIHW", "NCHW"))
        h = h + b.reshape(1, -1, 1, 1)
        if l < n - 1:
            h = jnp.maximum(h, 0.0)
    return h + x if add_residual else h


# ---------------------------------------------------------------------------
# db2 wavelet (DWTForward/DWTInverse, J=1, mode='zero') as fused filter-bank
# matmul kernels; several planes per grid step, yl / yh bands emitted directly.
# ---------------------------------------------------------------------------
_DB2_DEC_LO = np.array([-0.12940952255092145, 0.22414386804185735,
                        0.8365163037378079, 0.48296291314469025], np.float64)
_DB2_DEC_HI = np.array([-0.48296291314469025, 0.8365163037378079,
                        -0.22414386804185735, -0.12940952255092145], np.float64)


def _analysis_pair(N):
    # Zero-padded db2 analysis operators (lowpass A0, highpass A1), matching
    # pytorch_wavelets afb1d(mode='zero'); their transposes are the synthesis
    # operators for even N.
    L = 4
    h0 = _DB2_DEC_LO[::-1]
    h1 = _DB2_DEC_HI[::-1]
    out = (N + L - 1) // 2
    p = 2 * (out - 1) - N + L
    assert p % 2 == 0, "even spatial sizes only"
    pleft = p // 2
    A0 = np.zeros((out, N), np.float32)
    A1 = np.zeros((out, N), np.float32)
    for i in range(out):
        for j in range(N):
            k = j - 2 * i + pleft
            if 0 <= k < L:
                A0[i, j] = h0[k]
                A1[i, j] = h1[k]
    return A0, A1, out


def _dwt2_kernel(x_ref, a0h_ref, a1h_ref, a0wt_ref, a1wt_ref, yl_ref, yh_ref):
    # x_ref: (P, H, W).  Emits yl (P, fh, fw) and yh (P, 3, fh, fw) directly
    # (band order k = 2*rW + sH, as before) -> no XLA transpose afterwards.
    P = x_ref.shape[0]
    for p in range(P):
        xp = x_ref[p]
        t0 = jnp.dot(xp, a0wt_ref[...], preferred_element_type=jnp.float32)
        t1 = jnp.dot(xp, a1wt_ref[...], preferred_element_type=jnp.float32)
        yl_ref[p] = jnp.dot(a0h_ref[...], t0, preferred_element_type=jnp.float32)
        yh_ref[p, 0] = jnp.dot(a1h_ref[...], t0, preferred_element_type=jnp.float32)
        yh_ref[p, 1] = jnp.dot(a0h_ref[...], t1, preferred_element_type=jnp.float32)
        yh_ref[p, 2] = jnp.dot(a1h_ref[...], t1, preferred_element_type=jnp.float32)


def dwt2(x):
    # x: (B, C, H, W) -> yl (B, C, fh, fw), yh (B, C, 3, fh, fw)
    B, C, H, W = x.shape
    A0h, A1h, fh = _analysis_pair(H)
    A0w, A1w, fw = _analysis_pair(W)
    BC = B * C
    P = _plane_tile(BC, H * W)
    BCp = _round_up(BC, P)

    xf = x.reshape(BC, H, W).astype(jnp.float32)
    if BCp > BC:
        xf = jnp.pad(xf, ((0, BCp - BC), (0, 0), (0, 0)))

    ylp, yhp = pl.pallas_call(
        _dwt2_kernel,
        out_shape=(jax.ShapeDtypeStruct((BCp, fh, fw), jnp.float32),
                   jax.ShapeDtypeStruct((BCp, 3, fh, fw), jnp.float32)),
        grid=(BCp // P,),
        in_specs=[
            pl.BlockSpec((P, H, W), lambda i: (i, 0, 0)),
            pl.BlockSpec((fh, H), lambda i: (0, 0)),
            pl.BlockSpec((fh, H), lambda i: (0, 0)),
            pl.BlockSpec((W, fw), lambda i: (0, 0)),
            pl.BlockSpec((W, fw), lambda i: (0, 0)),
        ],
        out_specs=(pl.BlockSpec((P, fh, fw), lambda i: (i, 0, 0)),
                   pl.BlockSpec((P, 3, fh, fw), lambda i: (i, 0, 0, 0))),
        compiler_params=pltpu.CompilerParams(
            dimension_semantics=("parallel",),
            vmem_limit_bytes=_VMEM_LIMIT_BYTES),
    )(xf, jnp.asarray(A0h), jnp.asarray(A1h),
      jnp.asarray(A0w.T), jnp.asarray(A1w.T))

    yl = ylp[:BC].reshape(B, C, fh, fw)
    yh = yhp[:BC].reshape(B, C, 3, fh, fw)
    return yl, yh


def _idwt2_kernel(yl_ref, yh_ref, a0ht_ref, a1ht_ref, a0w_ref, a1w_ref, o_ref):
    # Per-plane synthesis:  x = A0h^T LL A0w + A1h^T LH A0w
    #                         + A0h^T HL A1w + A1h^T HH A1w
    P = yl_ref.shape[0]
    for p in range(P):
        ll = yl_ref[p]
        lh = yh_ref[p, 0]
        hl = yh_ref[p, 1]
        hh = yh_ref[p, 2]
        u0 = (jnp.dot(a0ht_ref[...], ll, preferred_element_type=jnp.float32)
              + jnp.dot(a1ht_ref[...], lh, preferred_element_type=jnp.float32))
        u1 = (jnp.dot(a0ht_ref[...], hl, preferred_element_type=jnp.float32)
              + jnp.dot(a1ht_ref[...], hh, preferred_element_type=jnp.float32))
        o_ref[p] = (jnp.dot(u0, a0w_ref[...], preferred_element_type=jnp.float32)
                    + jnp.dot(u1, a1w_ref[...], preferred_element_type=jnp.float32))


def idwt2(yl, yh):
    # yl: (B, C, fh, fw), yh: (B, C, 3, fh, fw) -> (B, C, 2*fh-2, 2*fw-2)
    B, C, fh, fw = yl.shape
    H, W = 2 * fh - 2, 2 * fw - 2
    A0h, A1h, _ = _analysis_pair(H)
    A0w, A1w, _ = _analysis_pair(W)
    BC = B * C
    P = _plane_tile(BC, H * W)
    BCp = _round_up(BC, P)

    ylf = yl.reshape(BC, fh, fw).astype(jnp.float32)
    yhf = yh.reshape(BC, 3, fh, fw).astype(jnp.float32)
    if BCp > BC:
        ylf = jnp.pad(ylf, ((0, BCp - BC), (0, 0), (0, 0)))
        yhf = jnp.pad(yhf, ((0, BCp - BC), (0, 0), (0, 0), (0, 0)))

    out = pl.pallas_call(
        _idwt2_kernel,
        out_shape=jax.ShapeDtypeStruct((BCp, H, W), jnp.float32),
        grid=(BCp // P,),
        in_specs=[
            pl.BlockSpec((P, fh, fw), lambda i: (i, 0, 0)),
            pl.BlockSpec((P, 3, fh, fw), lambda i: (i, 0, 0, 0)),
            pl.BlockSpec((H, fh), lambda i: (0, 0)),
            pl.BlockSpec((H, fh), lambda i: (0, 0)),
            pl.BlockSpec((fw, W), lambda i: (0, 0)),
            pl.BlockSpec((fw, W), lambda i: (0, 0)),
        ],
        out_specs=pl.BlockSpec((P, H, W), lambda i: (i, 0, 0)),
        compiler_params=pltpu.CompilerParams(
            dimension_semantics=("parallel",),
            vmem_limit_bytes=_VMEM_LIMIT_BYTES),
    )(ylf, yhf, jnp.asarray(A0h.T), jnp.asarray(A1h.T),
      jnp.asarray(A0w), jnp.asarray(A1w))
    return out[:BC].reshape(B, C, H, W)


# ---------------------------------------------------------------------------
# Parameter init (PyTorch Conv2d default-like)
# ---------------------------------------------------------------------------
def _conv_init(key, cin, cout):
    k1, k2 = jax.random.split(key)
    bound = 1.0 / np.sqrt(cin * 9)
    w = jax.random.uniform(k1, (cout, cin, 3, 3), jnp.float32, -bound, bound)
    b = jax.random.uniform(k2, (cout,), jnp.float32, -bound, bound)
    return w, b


def init_params(key):
    ks = jax.random.split(key, 6)
    subnet = {}
    for i, (cin, cout) in enumerate([(3, 24), (24, 24), (24, 24), (24, 3)], 1):
        w, b = _conv_init(ks[i - 1], cin, cout)
        subnet[f"w{i}"], subnet[f"b{i}"] = w, b
    res = {}
    for i, (cin, cout) in enumerate([(9, 9), (9, 9)], 1):
        w, b = _conv_init(ks[3 + i], cin, cout)
        res[f"w{i}"], res[f"b{i}"] = w, b
    return {"subnet44": subnet, "res9": res}


# ---------------------------------------------------------------------------
# WMDCNN forward
# ---------------------------------------------------------------------------
def wmdcnn_forward(params, x, target=None, is_training=True):
    B, _, h, w = x.shape
    if h % 2 == 1 and w % 2 == 1:
        xp = jnp.pad(x, ((0, 0), (0, 0), (1, 1), (1, 1)), mode="edge")
        x = xp[:, :, 0:-1, 0:-1]
    elif h % 2 == 1:
        xp = jnp.pad(x, ((0, 0), (0, 0), (1, 1), (1, 1)), mode="edge")
        x = xp[:, :, 0:-1, 1:-1]
    elif w % 2 == 1:
        xp = jnp.pad(x, ((0, 0), (0, 0), (1, 1), (1, 1)), mode="edge")
        x = xp[:, :, 1:-1, 0:-1]

    if is_training:
        t_yl, t_yh4 = dwt2(target)
        t_fh, t_fw = t_yh4.shape[-2], t_yh4.shape[-1]
        t_yh = t_yh4.reshape(B, -1, t_fh, t_fw)

    yl, yh4 = dwt2(x)
    fh, fw = yh4.shape[-2], yh4.shape[-1]
    yh = yh4.reshape(B, -1, fh, fw)

    yl1 = subnet44_apply(params["subnet44"], yl)   # = subnet44(yl) + yl
    yh1 = res9_apply(params["res9"], yh)           # = res9(yh)   + yh

    out = idwt2(yl1, yh1.reshape(B, -1, 3, fh, fw))

    if h % 2 == 1 and w % 2 == 1:
        out = out[:, :, 1:, 1:]
    elif h % 2 == 1:
        out = out[:, :, 1:, :]
    elif w % 2 == 1:
        out = out[:, :, :, 1:]

    if is_training:
        return yl1, yh1, t_yl, t_yh, out
    return out


if __name__ == "__main__":
    key = jax.random.PRNGKey(0)
    kx, kt, kp = jax.random.split(key, 3)
    x = jax.random.normal(kx, (2, 3, 16, 16), jnp.float32)
    target = jax.random.normal(kt, (2, 3, 16, 16), jnp.float32)
    params = init_params(kp)

    # Wavelet kernels sanity check: db2 + zero padding is perfect reconstruction.
    xr = idwt2(*dwt2(x))
    jax.block_until_ready(xr)
    assert np.allclose(np.asarray(xr), np.asarray(x), rtol=1e-4, atol=1e-4)

    # Fused conv stacks vs. pure-JAX f32 reference (loose tolerance for bf16).
    yl_t, yh4_t = dwt2(x)
    yh_t = yh4_t.reshape(2, -1, 9, 9)
    sp = params["subnet44"]
    sub_layers = [(sp[f"w{i}"], sp[f"b{i}"]) for i in range(1, 5)]
    err_sub = float(jnp.max(jnp.abs(subnet44_apply(sp, yl_t)
                                    - _conv_stack_ref(sub_layers, yl_t))))
    rp = params["res9"]
    res_layers = [(rp[f"w{i}"], rp[f"b{i}"]) for i in range(1, 3)]
    err_res = float(jnp.max(jnp.abs(res9_apply(rp, yh_t)
                                    - _conv_stack_ref(res_layers, yh_t))))
    assert err_sub < 0.15 and err_res < 0.15, (err_sub, err_res)

    fwd = jax.jit(functools.partial(wmdcnn_forward, is_training=True))
    yl1, yh1, t_yl, t_yh, out = fwd(params, x, target)
    jax.block_until_ready((yl1, yh1, t_yl, t_yh, out))

    assert yl1.shape == (2, 3, 9, 9)
    assert yh1.shape == (2, 9, 9, 9)
    assert t_yl.shape == (2, 3, 9, 9)
    assert t_yh.shape == (2, 9, 9, 9)
    assert out.shape == (2, 3, 16, 16)
    assert np.isfinite(np.asarray(out)).all()
    print("KERNEL_OK")
</pallas_src>

<mosaic_0001>
module attributes {stable_mosaic.version = 11 : i64} {
  func.func @_dwt2_kernel(%arg0: i32, %arg1: memref<3x16x16xf32, #tpu.memory_space<vmem>>, %arg2: memref<9x16xf32, #tpu.memory_space<vmem>>, %arg3: memref<9x16xf32, #tpu.memory_space<vmem>>, %arg4: memref<16x9xf32, #tpu.memory_space<vmem>>, %arg5: memref<16x9xf32, #tpu.memory_space<vmem>>, %arg6: memref<3x9x9xf32, #tpu.memory_space<vmem>>, %arg7: memref<3x3x9x9xf32, #tpu.memory_space<vmem>>) attributes {dimension_semantics = [#tpu.dimension_semantics<parallel>], iteration_bounds = array<i64: 2>, scalar_prefetch = 0 : i64, scratch_operands = 0 : i64, tpu.core_type = #tpu.core_type<tc>, window_params = [{transform_indices = @transform_0, window_bounds = array<i64: 3, 16, 16>}, {pipeline_mode = #tpu.pipeline_mode<synchronous>, transform_indices = @transform_1, window_bounds = array<i64: 9, 16>}, {pipeline_mode = #tpu.pipeline_mode<synchronous>, transform_indices = @transform_2, window_bounds = array<i64: 9, 16>}, {pipeline_mode = #tpu.pipeline_mode<synchronous>, transform_indices = @transform_3, window_bounds = array<i64: 16, 9>}, {pipeline_mode = #tpu.pipeline_mode<synchronous>, transform_indices = @transform_4, window_bounds = array<i64: 16, 9>}, {transform_indices = @transform_5, window_bounds = array<i64: 3, 9, 9>}, {transform_indices = @transform_6, window_bounds = array<i64: 3, 3, 9, 9>}]} {
    %c0 = arith.constant 0 : index
    %c0_0 = arith.constant 0 : index
    %c0_1 = arith.constant 0 : index
    %0 = vector.load %arg1[%c0, %c0_0, %c0_1] : memref<3x16x16xf32, #tpu.memory_space<vmem>>, vector<1x16x16xf32>
    %1 = vector.shape_cast %0 : vector<1x16x16xf32> to vector<16x16xf32>
    %c0_2 = arith.constant 0 : index
    %c0_3 = arith.constant 0 : index
    %2 = vector.load %arg4[%c0_2, %c0_3] : memref<16x9xf32, #tpu.memory_space<vmem>>, vector<16x9xf32>
    %cst = arith.constant dense<0.000000e+00> : vector<16x9xf32>
    %3 = tpu.matmul %1, %2, %cst {dimension_numbers = #tpu.dot_dimension_numbers<[1], [0], [0], [1], [0, 0, 1, 1], [], []>} : vector<16x16xf32>, vector<16x9xf32>, vector<16x9xf32> -> vector<16x9xf32>
    %c0_4 = arith.constant 0 : index
    %c0_5 = arith.constant 0 : index
    %4 = vector.load %arg5[%c0_4, %c0_5] : memref<16x9xf32, #tpu.memory_space<vmem>>, vector<16x9xf32>
    %cst_6 = arith.constant dense<0.000000e+00> : vector<16x9xf32>
    %5 = tpu.matmul %1, %4, %cst_6 {dimension_numbers = #tpu.dot_dimension_numbers<[1], [0], [0], [1], [0, 0, 1, 1], [], []>} : vector<16x16xf32>, vector<16x9xf32>, vector<16x9xf32> -> vector<16x9xf32>
    %c0_7 = arith.constant 0 : index
    %c0_8 = arith.constant 0 : index
    %6 = vector.load %arg2[%c0_7, %c0_8] : memref<9x16xf32, #tpu.memory_space<vmem>>, vector<9x16xf32>
    %cst_9 = arith.constant dense<0.000000e+00> : vector<9x9xf32>
    %7 = tpu.matmul %6, %3, %cst_9 {dimension_numbers = #tpu.dot_dimension_numbers<[1], [0], [0], [1], [0, 0, 1, 1], [], []>} : vector<9x16xf32>, vector<16x9xf32>, vector<9x9xf32> -> vector<9x9xf32>
    %c0_10 = arith.constant 0 : index
    %c0_11 = arith.constant 0 : index
    %c0_12 = arith.constant 0 : index
    %8 = vector.load %arg6[%c0_10, %c0_11, %c0_12] : memref<3x9x9xf32, #tpu.memory_space<vmem>>, vector<1x9x9xf32>
    %9 = vector.shape_cast %8 : vector<1x9x9xf32> to vector<9x9xf32>
    %10 = vector.shape_cast %7 : vector<9x9xf32> to vector<1x9x9xf32>
    tpu.vector_store %arg6[%c0_10, %c0_11, %c0_12], %10 {strides = array<i32>} : memref<3x9x9xf32, #tpu.memory_space<vmem>>, vector<1x9x9xf32>,
    %c0_13 = arith.constant 0 : index
    %c0_14 = arith.constant 0 : index
    %11 = vector.load %arg3[%c0_13, %c0_14] : memref<9x16xf32, #tpu.memory_space<vmem>>, vector<9x16xf32>
    %cst_15 = arith.constant dense<0.000000e+00> : vector<9x9xf32>
    %12 = tpu.matmul %11, %3, %cst_15 {dimension_numbers = #tpu.dot_dimension_numbers<[1], [0], [0], [1], [0, 0, 1, 1], [], []>} : vector<9x16xf32>, vector<16x9xf32>, vector<9x9xf32> -> vector<9x9xf32>
    %c0_16 = arith.constant 0 : index
    %c0_17 = arith.constant 0 : index
    %c0_18 = arith.constant 0 : index
    %c0_19 = arith.constant 0 : index
    %13 = vector.load %arg7[%c0_16, %c0_17, %c0_18, %c0_19] : memref<3x3x9x9xf32, #tpu.memory_space<vmem>>, vector<1x1x9x9xf32>
    %14 = vector.shape_cast %13 : vector<1x1x9x9xf32> to vector<9x9xf32>
    %15 = vector.shape_cast %12 : vector<9x9xf32> to vector<1x1x9x9xf32>
    tpu.vector_store %arg7[%c0_16, %c0_17, %c0_18, %c0_19], %15 {strides = array<i32>} : memref<3x3x9x9xf32, #tpu.memory_space<vmem>>, vector<1x1x9x9xf32>,
    %c0_20 = arith.constant 0 : index
    %c0_21 = arith.constant 0 : index
    %16 = vector.load %arg2[%c0_20, %c0_21] : memref<9x16xf32, #tpu.memory_space<vmem>>, vector<9x16xf32>
    %cst_22 = arith.constant dense<0.000000e+00> : vector<9x9xf32>
    %17 = tpu.matmul %16, %5, %cst_22 {dimension_numbers = #tpu.dot_dimension_numbers<[1], [0], [0], [1], [0, 0, 1, 1], [], []>} : vector<9x16xf32>, vector<16x9xf32>, vector<9x9xf32> -> vector<9x9xf32>
    %c0_23 = arith.constant 0 : index
    %c1 = arith.constant 1 : index
    %c0_24 = arith.constant 0 : index
    %c0_25 = arith.constant 0 : index
    %18 = vector.load %arg7[%c0_23, %c1, %c0_24, %c0_25] : memref<3x3x9x9xf32, #tpu.memory_space<vmem>>, vector<1x1x9x9xf32>
    %19 = vector.shape_cast %18 : vector<1x1x9x9xf32> to vector<9x9xf32>
    %20 = vector.shape_cast %17 : vector<9x9xf32> to vector<1x1x9x9xf32>
    tpu.vector_store %arg7[%c0_23, %c1, %c0_24, %c0_25], %20 {strides = array<i32>} : memref<3x3x9x9xf32, #tpu.memory_space<vmem>>, vector<1x1x9x9xf32>,
    %c0_26 = arith.constant 0 : index
    %c0_27 = arith.constant 0 : index
    %21 = vector.load %arg3[%c0_26, %c0_27] : memref<9x16xf32, #tpu.memory_space<vmem>>, vector<9x16xf32>
    %cst_28 = arith.constant dense<0.000000e+00> : vector<9x9xf32>
    %22 = tpu.matmul %21, %5, %cst_28 {dimension_numbers = #tpu.dot_dimension_numbers<[1], [0], [0], [1], [0, 0, 1, 1], [], []>} : vector<9x16xf32>, vector<16x9xf32>, vector<9x9xf32> -> vector<9x9xf32>
    %c0_29 = arith.constant 0 : index
    %c2 = arith.constant 2 : index
    %c0_30 = arith.constant 0 : index
    %c0_31 = arith.constant 0 : index
    %23 = vector.load %arg7[%c0_29, %c2, %c0_30, %c0_31] : memref<3x3x9x9xf32, #tpu.memory_space<vmem>>, vector<1x1x9x9xf32>
    %24 = vector.shape_cast %23 : vector<1x1x9x9xf32> to vector<9x9xf32>
    %25 = vector.shape_cast %22 : vector<9x9xf32> to vector<1x1x9x9xf32>
    tpu.vector_store %arg7[%c0_29, %c2, %c0_30, %c0_31], %25 {strides = array<i32>} : memref<3x3x9x9xf32, #tpu.memory_space<vmem>>, vector<1x1x9x9xf32>,
    %c1_32 = arith.constant 1 : index
    %c0_33 = arith.constant 0 : index
    %c0_34 = arith.constant 0 : index
    %26 = vector.load %arg1[%c1_32, %c0_33, %c0_34] : memref<3x16x16xf32, #tpu.memory_space<vmem>>, vector<1x16x16xf32>
    %27 = vector.shape_cast %26 : vector<1x16x16xf32> to vector<16x16xf32>
    %c0_35 = arith.constant 0 : index
    %c0_36 = arith.constant 0 : index
    %28 = vector.load %arg4[%c0_35, %c0_36] : memref<16x9xf32, #tpu.memory_space<vmem>>, vector<16x9xf32>
    %cst_37 = arith.constant dense<0.000000e+00> : vector<16x9xf32>
    %29 = tpu.matmul %27, %28, %cst_37 {dimension_numbers = #tpu.dot_dimension_numbers<[1], [0], [0], [1], [0, 0, 1, 1], [], []>} : vector<16x16xf32>, vector<16x9xf32>, vector<16x9xf32> -> vector<16x9xf32>
    %c0_38 = arith.constant 0 : index
    %c0_39 = arith.constant 0 : index
    %30 = vector.load %arg5[%c0_38, %c0_39] : memref<16x9xf32, #tpu.memory_space<vmem>>, vector<16x9xf32>
    %cst_40 = arith.constant dense<0.000000e+00> : vector<16x9xf32>
    %31 = tpu.matmul %27, %30, %cst_40 {dimension_numbers = #tpu.dot_dimension_numbers<[1], [0], [0], [1], [0, 0, 1, 1], [], []>} : vector<16x16xf32>, vector<16x9xf32>, vector<16x9xf32> -> vector<16x9xf32>
    %c0_41 = arith.constant 0 : index
    %c0_42 = arith.constant 0 : index
    %32 = vector.load %arg2[%c0_41, %c0_42] : memref<9x16xf32, #tpu.memory_space<vmem>>, vector<9x16xf32>
    %cst_43 = arith.constant dense<0.000000e+00> : vector<9x9xf32>
    %33 = tpu.matmul %32, %29, %cst_43 {dimension_numbers = #tpu.dot_dimension_numbers<[1], [0], [0], [1], [0, 0, 1, 1], [], []>} : vector<9x16xf32>, vector<16x9xf32>, vector<9x9xf32> -> vector<9x9xf32>
    %c1_44 = arith.constant 1 : index
    %c0_45 = arith.constant 0 : index
    %c0_46 = arith.constant 0 : index
    %34 = vector.load %arg6[%c1_44, %c0_45, %c0_46] : memref<3x9x9xf32, #tpu.memory_space<vmem>>, vector<1x9x9xf32>
    %35 = vector.shape_cast %34 : vector<1x9x9xf32> to vector<9x9xf32>
    %36 = vector.shape_cast %33 : vector<9x9xf32> to vector<1x9x9xf32>
    tpu.vector_store %arg6[%c1_44, %c0_45, %c0_46], %36 {strides = array<i32>} : memref<3x9x9xf32, #tpu.memory_space<vmem>>, vector<1x9x9xf32>,
    %c0_47 = arith.constant 0 : index
    %c0_48 = arith.constant 0 : index
    %37 = vector.load %arg3[%c0_47, %c0_48] : memref<9x16xf32, #tpu.memory_space<vmem>>, vector<9x16xf32>
    %cst_49 = arith.constant dense<0.000000e+00> : vector<9x9xf32>
    %38 = tpu.matmul %37, %29, %cst_49 {dimension_numbers = #tpu.dot_dimension_numbers<[1], [0], [0], [1], [0, 0, 1, 1], [], []>} : vector<9x16xf32>, vector<16x9xf32>, vector<9x9xf32> -> vector<9x9xf32>
    %c1_50 = arith.constant 1 : index
    %c0_51 = arith.constant 0 : index
    %c0_52 = arith.constant 0 : index
    %c0_53 = arith.constant 0 : index
    %39 = vector.load %arg7[%c1_50, %c0_51, %c0_52, %c0_53] : memref<3x3x9x9xf32, #tpu.memory_space<vmem>>, vector<1x1x9x9xf32>
    %40 = vector.shape_cast %39 : vector<1x1x9x9xf32> to vector<9x9xf32>
    %41 = vector.shape_cast %38 : vector<9x9xf32> to vector<1x1x9x9xf32>
    tpu.vector_store %arg7[%c1_50, %c0_51, %c0_52, %c0_53], %41 {strides = array<i32>} : memref<3x3x9x9xf32, #tpu.memory_space<vmem>>, vector<1x1x9x9xf32>,
    %c0_54 = arith.constant 0 : index
    %c0_55 = arith.constant 0 : index
    %42 = vector.load %arg2[%c0_54, %c0_55] : memref<9x16xf32, #tpu.memory_space<vmem>>, vector<9x16xf32>
    %cst_56 = arith.constant dense<0.000000e+00> : vector<9x9xf32>
    %43 = tpu.matmul %42, %31, %cst_56 {dimension_numbers = #tpu.dot_dimension_numbers<[1], [0], [0], [1], [0, 0, 1, 1], [], []>} : vector<9x16xf32>, vector<16x9xf32>, vector<9x9xf32> -> vector<9x9xf32>
    %c1_57 = arith.constant 1 : index
    %c1_58 = arith.constant 1 : index
    %c0_59 = arith.constant 0 : index
    %c0_60 = arith.constant 0 : index
    %44 = vector.load %arg7[%c1_57, %c1_58, %c0_59, %c0_60] : memref<3x3x9x9xf32, #tpu.memory_space<vmem>>, vector<1x1x9x9xf32>
    %45 = vector.shape_cast %44 : vector<1x1x9x9xf32> to vector<9x9xf32>
    %46 = vector.shape_cast %43 : vector<9x9xf32> to vector<1x1x9x9xf32>
    tpu.vector_store %arg7[%c1_57, %c1_58, %c0_59, %c0_60], %46 {strides = array<i32>} : memref<3x3x9x9xf32, #tpu.memory_space<vmem>>, vector<1x1x9x9xf32>,
    %c0_61 = arith.constant 0 : index
    %c0_62 = arith.constant 0 : index
    %47 = vector.load %arg3[%c0_61, %c0_62] : memref<9x16xf32, #tpu.memory_space<vmem>>, vector<9x16xf32>
    %cst_63 = arith.constant dense<0.000000e+00> : vector<9x9xf32>
    %48 = tpu.matmul %47, %31, %cst_63 {dimension_numbers = #tpu.dot_dimension_numbers<[1], [0], [0], [1], [0, 0, 1, 1], [], []>} : vector<9x16xf32>, vector<16x9xf32>, vector<9x9xf32> -> vector<9x9xf32>
    %c1_64 = arith.constant 1 : index
    %c2_65 = arith.constant 2 : index
    %c0_66 = arith.constant 0 : index
    %c0_67 = arith.constant 0 : index
    %49 = vector.load %arg7[%c1_64, %c2_65, %c0_66, %c0_67] : memref<3x3x9x9xf32, #tpu.memory_space<vmem>>, vector<1x1x9x9xf32>
    %50 = vector.shape_cast %49 : vector<1x1x9x9xf32> to vector<9x9xf32>
    %51 = vector.shape_cast %48 : vector<9x9xf32> to vector<1x1x9x9xf32>
    tpu.vector_store %arg7[%c1_64, %c2_65, %c0_66, %c0_67], %51 {strides = array<i32>} : memref<3x3x9x9xf32, #tpu.memory_space<vmem>>, vector<1x1x9x9xf32>,
    %c2_68 = arith.constant 2 : index
    %c0_69 = arith.constant 0 : index
    %c0_70 = arith.constant 0 : index
    %52 = vector.load %arg1[%c2_68, %c0_69, %c0_70] : memref<3x16x16xf32, #tpu.memory_space<vmem>>, vector<1x16x16xf32>
    %53 = vector.shape_cast %52 : vector<1x16x16xf32> to vector<16x16xf32>
    %c0_71 = arith.constant 0 : index
    %c0_72 = arith.constant 0 : index
    %54 = vector.load %arg4[%c0_71, %c0_72] : memref<16x9xf32, #tpu.memory_space<vmem>>, vector<16x9xf32>
    %cst_73 = arith.constant dense<0.000000e+00> : vector<16x9xf32>
    %55 = tpu.matmul %53, %54, %cst_73 {dimension_numbers = #tpu.dot_dimension_numbers<[1], [0], [0], [1], [0, 0, 1, 1], [], []>} : vector<16x16xf32>, vector<16x9xf32>, vector<16x9xf32> -> vector<16x9xf32>
    %c0_74 = arith.constant 0 : index
    %c0_75 = arith.constant 0 : index
    %56 = vector.load %arg5[%c0_74, %c0_75] : memref<16x9xf32, #tpu.memory_space<vmem>>, vector<16x9xf32>
    %cst_76 = arith.constant dense<0.000000e+00> : vector<16x9xf32>
    %57 = tpu.matmul %53, %56, %cst_76 {dimension_numbers = #tpu.dot_dimension_numbers<[1], [0], [0], [1], [0, 0, 1, 1], [], []>} : vector<16x16xf32>, vector<16x9xf32>, vector<16x9xf32> -> vector<16x9xf32>
    %c0_77 = arith.constant 0 : index
    %c0_78 = arith.constant 0 : index
    %58 = vector.load %arg2[%c0_77, %c0_78] : memref<9x16xf32, #tpu.memory_space<vmem>>, vector<9x16xf32>
    %cst_79 = arith.constant dense<0.000000e+00> : vector<9x9xf32>
    %59 = tpu.matmul %58, %55, %cst_79 {dimension_numbers = #tpu.dot_dimension_numbers<[1], [0], [0], [1], [0, 0, 1, 1], [], []>} : vector<9x16xf32>, vector<16x9xf32>, vector<9x9xf32> -> vector<9x9xf32>
    %c2_80 = arith.constant 2 : index
    %c0_81 = arith.constant 0 : index
    %c0_82 = arith.constant 0 : index
    %60 = vector.load %arg6[%c2_80, %c0_81, %c0_82] : memref<3x9x9xf32, #tpu.memory_space<vmem>>, vector<1x9x9xf32>
    %61 = vector.shape_cast %60 : vector<1x9x9xf32> to vector<9x9xf32>
    %62 = vector.shape_cast %59 : vector<9x9xf32> to vector<1x9x9xf32>
    tpu.vector_store %arg6[%c2_80, %c0_81, %c0_82], %62 {strides = array<i32>} : memref<3x9x9xf32, #tpu.memory_space<vmem>>, vector<1x9x9xf32>,
    %c0_83 = arith.constant 0 : index
    %c0_84 = arith.constant 0 : index
    %63 = vector.load %arg3[%c0_83, %c0_84] : memref<9x16xf32, #tpu.memory_space<vmem>>, vector<9x16xf32>
    %cst_85 = arith.constant dense<0.000000e+00> : vector<9x9xf32>
    %64 = tpu.matmul %63, %55, %cst_85 {dimension_numbers = #tpu.dot_dimension_numbers<[1], [0], [0], [1], [0, 0, 1, 1], [], []>} : vector<9x16xf32>, vector<16x9xf32>, vector<9x9xf32> -> vector<9x9xf32>
    %c2_86 = arith.constant 2 : index
    %c0_87 = arith.constant 0 : index
    %c0_88 = arith.constant 0 : index
    %c0_89 = arith.constant 0 : index
    %65 = vector.load %arg7[%c2_86, %c0_87, %c0_88, %c0_89] : memref<3x3x9x9xf32, #tpu.memory_space<vmem>>, vector<1x1x9x9xf32>
    %66 = vector.shape_cast %65 : vector<1x1x9x9xf32> to vector<9x9xf32>
    %67 = vector.shape_cast %64 : vector<9x9xf32> to vector<1x1x9x9xf32>
    tpu.vector_store %arg7[%c2_86, %c0_87, %c0_88, %c0_89], %67 {strides = array<i32>} : memref<3x3x9x9xf32, #tpu.memory_space<vmem>>, vector<1x1x9x9xf32>,
    %c0_90 = arith.constant 0 : index
    %c0_91 = arith.constant 0 : index
    %68 = vector.load %arg2[%c0_90, %c0_91] : memref<9x16xf32, #tpu.memory_space<vmem>>, vector<9x16xf32>
    %cst_92 = arith.constant dense<0.000000e+00> : vector<9x9xf32>
    %69 = tpu.matmul %68, %57, %cst_92 {dimension_numbers = #tpu.dot_dimension_numbers<[1], [0], [0], [1], [0, 0, 1, 1], [], []>} : vector<9x16xf32>, vector<16x9xf32>, vector<9x9xf32> -> vector<9x9xf32>
    %c2_93 = arith.constant 2 : index
    %c1_94 = arith.constant 1 : index
    %c0_95 = arith.constant 0 : index
    %c0_96 = arith.constant 0 : index
    %70 = vector.load %arg7[%c2_93, %c1_94, %c0_95, %c0_96] : memref<3x3x9x9xf32, #tpu.memory_space<vmem>>, vector<1x1x9x9xf32>
    %71 = vector.shape_cast %70 : vector<1x1x9x9xf32> to vector<9x9xf32>
    %72 = vector.shape_cast %69 : vector<9x9xf32> to vector<1x1x9x9xf32>
    tpu.vector_store %arg7[%c2_93, %c1_94, %c0_95, %c0_96], %72 {strides = array<i32>} : memref<3x3x9x9xf32, #tpu.memory_space<vmem>>, vector<1x1x9x9xf32>,
    %c0_97 = arith.constant 0 : index
    %c0_98 = arith.constant 0 : index
    %73 = vector.load %arg3[%c0_97, %c0_98] : memref<9x16xf32, #tpu.memory_space<vmem>>, vector<9x16xf32>
    %cst_99 = arith.constant dense<0.000000e+00> : vector<9x9xf32>
    %74 = tpu.matmul %73, %57, %cst_99 {dimension_numbers = #tpu.dot_dimension_numbers<[1], [0], [0], [1], [0, 0, 1, 1], [], []>} : vector<9x16xf32>, vector<16x9xf32>, vector<9x9xf32> -> vector<9x9xf32>
    %c2_100 = arith.constant 2 : index
    %c2_101 = arith.constant 2 : index
    %c0_102 = arith.constant 0 : index
    %c0_103 = arith.constant 0 : index
    %75 = vector.load %arg7[%c2_100, %c2_101, %c0_102, %c0_103] : memref<3x3x9x9xf32, #tpu.memory_space<vmem>>, vector<1x1x9x9xf32>
    %76 = vector.shape_cast %75 : vector<1x1x9x9xf32> to vector<9x9xf32>
    %77 = vector.shape_cast %74 : vector<9x9xf32> to vector<1x1x9x9xf32>
    tpu.vector_store %arg7[%c2_100, %c2_101, %c0_102, %c0_103], %77 {strides = array<i32>} : memref<3x3x9x9xf32, #tpu.memory_space<vmem>>, vector<1x1x9x9xf32>,
    return
  }
  func.func @transform_0(%arg0: i32) -> (i32, i32, i32) {
    %c0_i32 = arith.constant 0 : i32
    %c0_i32_0 = arith.constant 0 : i32
    %c0_i32_1 = arith.constant 0 : i32
    return %arg0, %c0_i32, %c0_i32_0 : i32, i32, i32
  }
  func.func @transform_1(%arg0: i32) -> (i32, i32) {
    %c0_i32 = arith.constant 0 : i32
    %c0_i32_0 = arith.constant 0 : i32
    %c0_i32_1 = arith.constant 0 : i32
    return %c0_i32, %c0_i32_0 : i32, i32
  }
  func.func @transform_2(%arg0: i32) -> (i32, i32) {
    %c0_i32 = arith.constant 0 : i32
    %c0_i32_0 = arith.constant 0 : i32
    %c0_i32_1 = arith.constant 0 : i32
    return %c0_i32, %c0_i32_0 : i32, i32
  }
  func.func @transform_3(%arg0: i32) -> (i32, i32) {
    %c0_i32 = arith.constant 0 : i32
    %c0_i32_0 = arith.constant 0 : i32
    %c0_i32_1 = arith.constant 0 : i32
    return %c0_i32, %c0_i32_0 : i32, i32
  }
  func.func @transform_4(%arg0: i32) -> (i32, i32) {
    %c0_i32 = arith.constant 0 : i32
    %c0_i32_0 = arith.constant 0 : i32
    %c0_i32_1 = arith.constant 0 : i32
    return %c0_i32, %c0_i32_0 : i32, i32
  }
  func.func @transform_5(%arg0: i32) -> (i32, i32, i32) {
    %c0_i32 = arith.constant 0 : i32
    %c0_i32_0 = arith.constant 0 : i32
    %c0_i32_1 = arith.constant 0 : i32
    return %arg0, %c0_i32, %c0_i32_0 : i32, i32, i32
  }
  func.func @transform_6(%arg0: i32) -> (i32, i32, i32, i32) {
    %c0_i32 = arith.constant 0 : i32
    %c0_i32_0 = arith.constant 0 : i32
    %c0_i32_1 = arith.constant 0 : i32
    %c0_i32_2 = arith.constant 0 : i32
    return %arg0, %c0_i32, %c0_i32_0, %c0_i32_1 : i32, i32, i32, i32
  }
}

</mosaic_0001>

<bundles_post_ra>
// kernel: tpu_custom_call.1
= control target key start
LH: loop header
LB: loop body
LE: loop exit
PB: predicated region body
PF: predicated region fallthrough
CT: control target
= control target key end

     0   :  { %12 = vsyncpa [#allocation3], 0  ;;  %s1782_s0 = inlined_call_operand.hbm [shape: f32[6,16,16], index: 0, kind: input, shape index: {}]   ;;  %s1783_s1 = inlined_call_operand.hbm [shape: f32[9,16], index: 1, kind: input, shape index: {}]   ;;  %s1784_s2 = inlined_call_operand.hbm [shape: f32[9,16], index: 2, kind: input, shape index: {}]   ;;  %s1785_s3 = inlined_call_operand.hbm [shape: f32[16,9], index: 3, kind: input, shape index: {}]   ;;  %s1786_s4 = inlined_call_operand.hbm [shape: f32[16,9], index: 4, kind: input, shape index: {}]   ;;  %s1787_s5 = inlined_call_operand.vmem [shape: f32[6,9,9], index: 5, kind: output, shape index: {0}]   ;;  %s1788_s6 = inlined_call_operand.vmem [shape: f32[6,3,9,9], index: 6, kind: output, shape index: {1}]  }
   0x1   :  { %14 = vsyncpa [#allocation3 + $0x1], 0 }
   0x2   :  { %15 = vsyncpa [#allocation5], 0 }
   0x3   :  { %16 = vsyncpa [#allocation8], 0  ;;  %s1497_s21 = smov 0   ;;  %s1499_s22 = smov 0  }
   0x4   :  { %s1501_s23 = smov 0   ;;  %s1503_s24 = smov 0  }
   0x5 LB: > { %s1789_s25 = sadd.s32 4294967295, %s1454_s24   ;;  %p42_p0 = scmp.ne.s32.totalorder %s1446_s22, %s1442_s21  ;;  %s1454_s24 = sphi %s1503_s24, %s1801_s24   ;;  %s1450_s23 = sphi %s1501_s23, %s1800_s23   ;;  %s1446_s22 = sphi %s1499_s22, %s1799_s22   ;;  %s1442_s21 = sphi %s1497_s21, %s1798_s21  }
   0x6   : > { %p1519_p1 = scmp.eq.s32.totalorder %s1789_s25, 0  ;;  %p1091_p2 = scmp.ge.s32.totalorder %s1454_s24, 1 }
   0x7   : > { %p189_p3 = scmp.lt.s32.totalorder %s1454_s24, 3  ;;  %s200_s30 = sshll.u32 %s1783_s1, 4  ;;  %s201_s30 = int_to_ptr.hbm [resolvable:$true] %s200_s30 }
   0x8   : > { %p1527_p4 = por %p1519_p1, %p42_p0  ;;  %s1456_s8 = smov [#allocation4]  }
   0x9   : > { %p1534_p5 = pnand %p1091_p2, %p189_p3  ;;  %s202_s9 = sshll.u32 %s1456_s8, 4  ;;  %s203_s9 = int_to_ptr.vmem [resolvable:$true] %s202_s9 }
   0xa   : > { %s228_s13 = sshll.u32 %s1785_s3, 4  ;;  %s1790_s14 = smov 128   ;;  %s229_s13 = int_to_ptr.hbm [resolvable:$true] %s228_s13 }
   0xb   : > { %p1198_p6 = pneg %p1534_p5  ;;  %s1458_s15 = smov 8  }
   0xc   : > { %s1459_s16 = smov [#allocation7]   ;;  %s214_s20 = sshll.u32 %s1784_s2, 4  ;;  %s215_s20 = int_to_ptr.hbm [resolvable:$true] %s214_s20 }
   0xd   : > { %p1542_p7 = pnand %p1198_p6, %p1519_p1  ;;  %s230_s17 = sshll.u32 %s1459_s16, 4  ;;  %s231_s17 = int_to_ptr.vmem [resolvable:$true] %s230_s17 }
   0xe   : > { %s242_s29 = sshll.u32 %s1786_s4, 4  ;;  %s1576_s12 = sadd.s32 1, %s1454_s24   ;;  %s243_s29 = int_to_ptr.hbm [resolvable:$true] %s242_s29 }
   0xf   : > { %1201 = dma.hbm_to_vmem [thread:$0]  (!%p1542_p7), %s201_s30, 256, %s203_s9, [#allocation5], %s1790_s14, %s1790_s14, %s1458_s15  }
  0x10   : > { %1207 = dma.hbm_to_vmem [thread:$0]  (!%p1542_p7), %s229_s13, 256, %s231_s17, [#allocation8], %s1790_s14, %s1790_s14, %s1458_s15  }
  0x11   : > { %s1460_s30 = smov [#allocation6]   ;;  %s1461_s9 = smov [#allocation9]  }
  0x12   : > { %s216_s8 = sshll.u32 %s1460_s30, 4  ;;  %s244_s11 = sshll.u32 %s1461_s9, 4  ;;  %s217_s8 = int_to_ptr.vmem [resolvable:$true] %s216_s8  ;;  %s245_s11 = int_to_ptr.vmem [resolvable:$true] %s244_s11 }
  0x13   : > { %1204 = dma.hbm_to_vmem [thread:$0]  (!%p1542_p7), %s215_s20, 256, %s217_s8, [#allocation5], %s1790_s14, %s1790_s14, %s1458_s15  }
  0x14   : > { %1210 = dma.hbm_to_vmem [thread:$0]  (!%p1542_p7), %s243_s29, 256, %s245_s11, [#allocation8], %s1790_s14, %s1790_s14, %s1458_s15  }
  0x15   : > { %s29_s13 = sadd.s32 1, %s1450_s23  ;;  %s26_s16 = ssub.s32 %s1454_s24, %s1576_s12 }
  0x16   : > { %p36_p8 = scmp.ne.s32.totalorder %s1450_s23, %s1446_s22  ;;  %p27_p9 = scmp.eq.s32.totalorder %s26_s16, 0 }
  0x17   : > { %p37_p10 = scmp.eq.s32.totalorder %s1454_s24, 0  ;;  %p1219_p11 = scmp.lt.s32.totalorder %s1454_s24, 2 }
  0x18   : > { %s258_s17 = sand.u32 1, %s1450_s23   ;;  %s1172_s20 = smul.u32 48, %s1454_s24 }
  0x19   : > { %s1587_s18 = scalar_select %p27_p9, %s1450_s23, %s29_s13  }
  0x1a   : > { %p38_p12 = por %p37_p10, %p36_p8  ;;  %s1177_s19 = smul.u32 48, %s258_s17 }
  0x1b   : > { %s268_s29 = scalar_lea.hbm %s1782_s0, %s1172_s20  ;;  %s259_s11 = scalar_lea.sflag [#allocation3], %s258_s17 }
  0x1c   : > { %p1590_p13 = pnand %p1219_p11, %p38_p12  ;;  %s262_s30 = scalar_lea.vmem [#allocation2], %s1177_s19 }
  0x1d   : > { %s271_s8 = sshll.u32 %s262_s30, 4  ;;  %s269_s9 = sshll.u32 %s268_s29, 4  ;;  %s272_s8 = int_to_ptr.vmem [resolvable:$true] %s271_s8  ;;  %s270_s9 = int_to_ptr.hbm [resolvable:$true] %s269_s9 }
  0x1e   : > { %s1382_s13 = sshra.s32 %s270_s9, 4  ;;  %p1386_p2 = pneg %p1590_p13  ;;  %s1383_s13 = int_to_ptr.hbm [resolvable:$true] %s1382_s13 }
  0x1f   : > { %s1384_s16 = scalar_lea.hbm %s1383_s13, 48  ;;  %s1389_s21 = scalar_lea.hbm %s1782_s0, 96 }
  0x20   : > { %p1385_p0 = scmp.ne.s32.totalorder %s1383_s13, %s1384_s16  ;;  %p1390_p7 = scmp.lt.s32.totalorder %s1383_s13, %s1782_s0 }
  0x21   : > { %p1391_p8 = scmp.lt.s32.totalorder %s1389_s21, %s1384_s16 }
  0x22   : > { %p1387_p3 = pnand %p1386_p2, %p1385_p0 }
  0x23   : > { %p1392_p9 = por %p1391_p8, %p1390_p7 }
  0x24   : > { %p1388_p6 = pneg %p1387_p3 }
  0x26   : > { %p1393_p10 = pnand %p1392_p9, %p1388_p6 }
  0x28   : > { %1396 = shalt.err (!%p1393_p10)
}
  0x29   : > { %s1796_s17 = smov 128   ;;  %283 = sbr.rel (%p1534_p5) target bundleno = 647 (0x287), region = 40 }
  0x2a   : > { %1214 = dma.hbm_to_vmem [thread:$0]  (!%p1590_p13), %s270_s9, 768, %s272_s8, %s259_s11, %s1796_s17, %s1796_s17, %s1458_s15  }
  0x2b   : > { %s285_s25 = sand.u32 (!%p1534_p5), 1, %s1446_s22  }
  0x2c   : > { %s1178_s14 = smul.u32 (!%p1534_p5), 48, %s285_s25  ;;  %s286_s19 = scalar_lea.sflag (!%p1534_p5), [#allocation3], %s285_s25 }
  0x2e   : > { %s1613_s29 = scalar_lea.vmem [#allocation2], %s1178_s14 }
  0x2f   : > { %1429 = dma.done.wait (%p1527_p4), %s286_s19, 768  }
  0x30   : > { %1431 = vsyncadd (%p1527_p4), %s286_s19, 4294966528 }
  0x31   : > { %1433 = dma.done.wait (%p1519_p1), [#allocation5], 512  }
  0x32   : > { %1435 = vsyncadd (%p1519_p1), [#allocation5], 4294966784 }
  0x33   : > { %1437 = dma.done.wait (%p1519_p1), [#allocation8], 512  }
  0x34   : > { %1439 = vsyncadd (%p1519_p1), [#allocation8], 4294966784  ;;  %v1627_v0 = vld [vmem:[#allocation7 + $0x8] sm:$0xff]  ;;  %v1629_v1 = vld [vmem:[#allocation7] sm:$0xff]  ;;  %vm365_vm0 = vcmask 130048   ;;  %s1797_s26 = sadd.s32 4294967295, %s1454_s24  }
  0x35   : > { %1173 = vmatpush.msra.mxu2 %v1627_v0  ;;  %v362_v2 = vld [vmem:[%s1613_s29 + $0x8] sm:$0xff]  ;;  %386 = vmatpush.msra.mxu0 %v1627_v0  ;;  %v361_v3 = vld [vmem:[%s1613_s29] sm:$0xff]  ;;  %v1123_v11 = vld [vmem:[%s1613_s29 + $0x10] sm:$0xff]  ;;  %s347_s27 = smul.u32 3, %s1797_s26  ;;  %vm451_vm1 = vcmask 72704   ;;  %vm453_vm2 = vcmask 65536  }
  0x36   : > { %v1635_v4 = vld [vmem:[#allocation9 + $0x8] sm:$0xff]  ;;  %v1643_v5 = vld [vmem:[#allocation9] sm:$0xff]  ;;  %v1649_v8 = vld [vmem:[#allocation4] sm:$0xff] }
  0x37   : > { %1175 = vmatpush.msra.mxu3 %v1635_v4  ;;  %411 = vmatpush.msra.mxu1 %v1635_v4  ;;  %v1651_v9 = vld [vmem:[#allocation6] sm:$0xff]  ;;  %v421_v10 = vld [vmem:[#allocation4 + $0x8] sm:$0x1]  ;;  %v456_v13 = vld [vmem:[#allocation6 + $0x8] sm:$0x1]  ;;  %p348_p1 = scmp.lt.s32.totalorder %s347_s27, 5 }
  0x38   : > { %1174 = vmatpush.msra.mxu2 %v1629_v1  ;;  %387 = vmatpush.msra.mxu0 %v1629_v1  ;;  %v1124_v12 = vld [vmem:[%s1613_s29 + $0x18] sm:$0xff]  ;;  %v1145_v25 = vld [vmem:[%s1613_s29 + $0x20] sm:$0xff]  ;;  %v1146_v26 = vld [vmem:[%s1613_s29 + $0x28] sm:$0xff] }
  0x39   : > { %1108 = vmatmul.msk.f32.vlgmr.msra.gmra.mxu2 %vm365_vm0, %v362_v2  ;;  %1107 = vmatmul.msk.f32.vlgmr.msra.gmra.mxu0 %vm365_vm0, %v361_v3  ;;  %v489_v16 = vld [vmem:[#allocation4 + $0x8] sm:$0x1]  ;;  %v523_v17 = vld [vmem:[#allocation6 + $0x8] sm:$0x1]  ;;  %s1803_s27 = smov (!%p348_p1, %s347_s27), 5 }
  0x3a   : > { %1176 = vmatpush.msra.mxu3 %v1643_v5  ;;  %412 = vmatpush.msra.mxu1 %v1643_v5  ;;  %s1171_s7 = sshll.u32 %s1803_s27, 4  ;;  %s1179_s24 = smul.u32 48, %s1803_s27  ;;  %v616_v23 = vld [vmem:[#allocation4 + $0x8] sm:$0x1]  ;;  %v650_v24 = vld [vmem:[#allocation6 + $0x8] sm:$0x1] }
  0x3b   : > { %1110 = vmatmul.msk.f32.vlgmr.msra.gmra.mxu3 %vm365_vm0, %v362_v2  ;;  %1109 = vmatmul.msk.f32.vlgmr.msra.gmra.mxu1 %vm365_vm0, %v361_v3  ;;  %s1680_s30 = scalar_lea.vmem %s1787_s5, %s1171_s7  ;;  %v684_v34 = vld [vmem:[#allocation4 + $0x8] sm:$0x1]  ;;  %v718_v35 = vld [vmem:[#allocation6 + $0x8] sm:$0x1] }
  0x3c   : > { %s1689_s11 = scalar_lea.vmem %s1788_s6, %s1179_s24  ;;  %v811_v44 = vld [vmem:[#allocation4 + $0x8] sm:$0x1]  ;;  %v845_v45 = vld [vmem:[#allocation6 + $0x8] sm:$0x1] }
  0x3d   : > { %v879_v46 = vld [vmem:[#allocation4 + $0x8] sm:$0x1]  ;;  %v913_v47 = vld [vmem:[#allocation6 + $0x8] sm:$0x1] }
  0xb6   : > { %v389_v7 = vpop.f32.mrf.mxu0 }
  0xb8   : > { %v414_v15 = vpop.f32.mrf.mxu1 }
  0xbc   : > { %v392_v6 = vpop.f32.mrf.mxu2 }
  0xbd   : > { %442 = vmatpush.msrb.mxu2 %v392_v6  ;;  %477 = vmatpush.msrb.mxu3 %v392_v6 }
  0xbe   : > { %v417_v14 = vpop.f32.mrf.mxu3 }
  0xbf   : > { %443 = vmatpush.msrb.mxu2 %v389_v7  ;;  %478 = vmatpush.msrb.mxu3 %v389_v7 }
  0xc0   : > { %1111 = vmatmul.msk.f32.vlgmr.msrb.gmra.mxu2 %vm365_vm0, %v1649_v8  ;;  %1113 = vmatmul.msk.f32.vlgmr.msrb.gmra.mxu3 %vm365_vm0, %v1651_v9 }
  0xc1   : > { %581 = vmatpush.msra.mxu2 %v1627_v0  ;;  %606 = vmatpush.msra.mxu3 %v1635_v4 }
  0xc2   : > { %510 = vmatpush.msrb.mxu0 %v417_v14  ;;  %544 = vmatpush.msrb.mxu1 %v417_v14 }
  0xc3   : > { %582 = vmatpush.msra.mxu2 %v1629_v1  ;;  %607 = vmatpush.msra.mxu3 %v1643_v5 }
  0xc4   : > { %511 = vmatpush.msrb.mxu0 %v414_v15  ;;  %545 = vmatpush.msrb.mxu1 %v414_v15 }
  0xc5   : > { %1115 = vmatmul.msk.f32.vlgmr.msrb.gmra.mxu0 %vm365_vm0, %v1649_v8  ;;  %1119 = vmatmul.msk.f32.vlgmr.msrb.gmra.mxu1 %vm365_vm0, %v1651_v9 }
  0xc8   : > { %1112 = vmatmul.msk.f32.gmra.mxu2 %vm365_vm0, %v421_v10  ;;  %1114 = vmatmul.msk.f32.gmra.mxu3 %vm365_vm0, %v456_v13 }
  0xcd   : > { %1116 = vmatmul.msk.f32.gmra.mxu0 %vm365_vm0, %v489_v16  ;;  %1120 = vmatmul.msk.f32.gmra.mxu1 %vm365_vm0, %v523_v17 }
  0xd0   : > { %1125 = vmatmul.msk.f32.vlgmr.msra.gmra.mxu2 %vm365_vm0, %v1123_v11  ;;  %1127 = vmatmul.msk.f32.vlgmr.msra.gmra.mxu3 %vm365_vm0, %v1123_v11 }
  0xd8   : > { %1126 = vmatmul.msk.f32.gmra.mxu2 %vm365_vm0, %v1124_v12  ;;  %1128 = vmatmul.msk.f32.gmra.mxu3 %vm365_vm0, %v1124_v12 }
 0x142   : > { %v513_v28 = vpop.f32.mrf.mxu0  ;;  %v547_v29 = vpop.f32.mrf.mxu1 }
 0x143   : > { %v445_v18 = vpop.f32.mrf.mxu2  ;;  %v480_v21 = vpop.f32.mrf.mxu3  ;;  %1117 = vst.msk [vmem:[%s1689_s11 + $0x10] sm:$0xff] %vm451_vm1, %v513_v28 }
 0x144   : > { %452 = vst.msk [vmem:[%s1680_s30] sm:$0xff] %vm451_vm1, %v445_v18 }
 0x145   : > { %486 = vst.msk [vmem:[%s1689_s11] sm:$0xff] %vm451_vm1, %v480_v21 }
 0x146   : > { %1121 = vst.msk [vmem:[%s1689_s11 + $0x20] sm:$0xff] %vm451_vm1, %v547_v29 }
 0x14a   : > { %v516_v31 = vpop.f32.mrf.mxu0  ;;  %v550_v32 = vpop.f32.mrf.mxu1 }
 0x14b   : > { %v448_v19 = vpop.f32.mrf.mxu2  ;;  %v483_v27 = vpop.f32.mrf.mxu3  ;;  %1118 = vst.msk [vmem:[%s1689_s11 + $0x18] sm:$0x1] %vm453_vm2, %v516_v31 }
 0x14c   : > { %454 = vst.msk [vmem:[%s1680_s30 + $0x8] sm:$0x1] %vm453_vm2, %v448_v19 }
 0x14d   : > { %487 = vst.msk [vmem:[%s1689_s11 + $0x8] sm:$0x1] %vm453_vm2, %v483_v27 }
 0x14e   : > { %1122 = vst.msk [vmem:[%s1689_s11 + $0x28] sm:$0x1] %vm453_vm2, %v550_v32 }
 0x153   : > { %v584_v20 = vpop.f32.mrf.mxu2  ;;  %v609_v30 = vpop.f32.mrf.mxu3 }
 0x15b   : > { %v587_v22 = vpop.f32.mrf.mxu2  ;;  %v612_v33 = vpop.f32.mrf.mxu3 }
 0x15c   : > { %637 = vmatpush.msra.mxu0 %v587_v22  ;;  %671 = vmatpush.msra.mxu1 %v587_v22 }
 0x15d   : > { %705 = vmatpush.msrb.mxu2 %v612_v33  ;;  %739 = vmatpush.msrb.mxu3 %v612_v33 }
 0x15e   : > { %638 = vmatpush.msra.mxu0 %v584_v20  ;;  %672 = vmatpush.msra.mxu1 %v584_v20 }
 0x15f   : > { %1129 = vmatmul.msk.f32.vlgmr.msra.gmra.mxu0 %vm365_vm0, %v1649_v8  ;;  %1133 = vmatmul.msk.f32.vlgmr.msra.gmra.mxu1 %vm365_vm0, %v1651_v9 }
 0x160   : > { %776 = vmatpush.msrb.mxu0 %v1627_v0  ;;  %801 = vmatpush.msrb.mxu1 %v1635_v4 }
 0x161   : > { %706 = vmatpush.msrb.mxu2 %v609_v30  ;;  %740 = vmatpush.msrb.mxu3 %v609_v30 }
 0x162   : > { %777 = vmatpush.msrb.mxu0 %v1629_v1  ;;  %802 = vmatpush.msrb.mxu1 %v1643_v5 }
 0x163   : > { %1137 = vmatmul.msk.f32.vlgmr.msrb.gmra.mxu2 %vm365_vm0, %v1649_v8  ;;  %1141 = vmatmul.msk.f32.vlgmr.msrb.gmra.mxu3 %vm365_vm0, %v1651_v9 }
 0x167   : > { %1130 = vmatmul.msk.f32.gmra.mxu0 %vm365_vm0, %v616_v23  ;;  %1134 = vmatmul.msk.f32.gmra.mxu1 %vm365_vm0, %v650_v24 }
 0x16b   : > { %1138 = vmatmul.msk.f32.gmra.mxu2 %vm365_vm0, %v684_v34  ;;  %1142 = vmatmul.msk.f32.gmra.mxu3 %vm365_vm0, %v718_v35 }
 0x16f   : > { %1147 = vmatmul.msk.f32.vlgmr.msrb.gmra.mxu0 %vm365_vm0, %v1145_v25  ;;  %1149 = vmatmul.msk.f32.vlgmr.msrb.gmra.mxu1 %vm365_vm0, %v1145_v25 }
 0x177   : > { %1148 = vmatmul.msk.f32.gmra.mxu0 %vm365_vm0, %v1146_v26  ;;  %1150 = vmatmul.msk.f32.gmra.mxu1 %vm365_vm0, %v1146_v26 }
 0x1dc   : > { %v640_v36 = vpop.f32.mrf.mxu0  ;;  %v674_v37 = vpop.f32.mrf.mxu1 }
 0x1dd   : > { %1131 = vst.msk [vmem:[%s1680_s30 + $0x10] sm:$0xff] %vm451_vm1, %v640_v36 }
 0x1de   : > { %1135 = vst.msk [vmem:[%s1689_s11 + $0x30] sm:$0xff] %vm451_vm1, %v674_v37 }
 0x1e4   : > { %v643_v38 = vpop.f32.mrf.mxu0  ;;  %v677_v39 = vpop.f32.mrf.mxu1 }
 0x1e5   : > { %1132 = vst.msk [vmem:[%s1680_s30 + $0x18] sm:$0x1] %vm453_vm2, %v643_v38 }
 0x1e6   : > { %1136 = vst.msk [vmem:[%s1689_s11 + $0x38] sm:$0x1] %vm453_vm2, %v677_v39  ;;  %v708_v48 = vpop.f32.mrf.mxu2  ;;  %v742_v49 = vpop.f32.mrf.mxu3 }
 0x1e7   : > { %1139 = vst.msk [vmem:[%s1689_s11 + $0x40] sm:$0xff] %vm451_vm1, %v708_v48 }
 0x1e8   : > { %1143 = vst.msk [vmem:[%s1689_s11 + $0x50] sm:$0xff] %vm451_vm1, %v742_v49 }
 0x1ec   : > { %v779_v40 = vpop.f32.mrf.mxu0  ;;  %v804_v41 = vpop.f32.mrf.mxu1 }
 0x1ee   : > { %v711_v50 = vpop.f32.mrf.mxu2  ;;  %v745_v51 = vpop.f32.mrf.mxu3 }
 0x1ef   : > { %1140 = vst.msk [vmem:[%s1689_s11 + $0x48] sm:$0x1] %vm453_vm2, %v711_v50 }
 0x1f0   : > { %1144 = vst.msk [vmem:[%s1689_s11 + $0x58] sm:$0x1] %vm453_vm2, %v745_v51 }
 0x1f4   : > { %v782_v42 = vpop.f32.mrf.mxu0  ;;  %v807_v43 = vpop.f32.mrf.mxu1 }
 0x1f5   : > { %832 = vmatpush.msra.mxu2 %v782_v42  ;;  %866 = vmatpush.msra.mxu3 %v782_v42 }
 0x1f6   : > { %900 = vmatpush.msra.mxu0 %v807_v43  ;;  %934 = vmatpush.msra.mxu1 %v807_v43 }
 0x1f7   : > { %833 = vmatpush.msra.mxu2 %v779_v40  ;;  %867 = vmatpush.msra.mxu3 %v779_v40 }
 0x1f8   : > { %901 = vmatpush.msra.mxu0 %v804_v41  ;;  %935 = vmatpush.msra.mxu1 %v804_v41 }
 0x1f9   : > { %1151 = vmatmul.msk.f32.vlgmr.msra.gmra.mxu2 %vm365_vm0, %v1649_v8  ;;  %1155 = vmatmul.msk.f32.vlgmr.msra.gmra.mxu3 %vm365_vm0, %v1651_v9 }
 0x1fa   : > { %1159 = vmatmul.msk.f32.vlgmr.msra.gmra.mxu0 %vm365_vm0, %v1649_v8  ;;  %1163 = vmatmul.msk.f32.vlgmr.msra.gmra.mxu1 %vm365_vm0, %v1651_v9 }
 0x201   : > { %1152 = vmatmul.msk.f32.gmra.mxu2 %vm365_vm0, %v811_v44  ;;  %1156 = vmatmul.msk.f32.gmra.mxu3 %vm365_vm0, %v845_v45 }
 0x202   : > { %1160 = vmatmul.msk.f32.gmra.mxu0 %vm365_vm0, %v879_v46  ;;  %1164 = vmatmul.msk.f32.gmra.mxu1 %vm365_vm0, %v913_v47 }
 0x277   : > { %v903_v52 = vpop.f32.mrf.mxu0  ;;  %v937_v53 = vpop.f32.mrf.mxu1 }
 0x278   : > { %1161 = vst.msk [vmem:[%s1689_s11 + $0x70] sm:$0xff] %vm451_vm1, %v903_v52 }
 0x279   : > { %1165 = vst.msk [vmem:[%s1689_s11 + $0x80] sm:$0xff] %vm451_vm1, %v937_v53 }
 0x27c   : > { %v835_v54 = vpop.f32.mrf.mxu2  ;;  %v869_v55 = vpop.f32.mrf.mxu3 }
 0x27d   : > { %1153 = vst.msk [vmem:[%s1680_s30 + $0x20] sm:$0xff] %vm451_vm1, %v835_v54 }
 0x27e   : > { %1157 = vst.msk [vmem:[%s1689_s11 + $0x60] sm:$0xff] %vm451_vm1, %v869_v55 }
 0x27f   : > { %v906_v56 = vpop.f32.mrf.mxu0  ;;  %v940_v57 = vpop.f32.mrf.mxu1 }
 0x280   : > { %1162 = vst.msk [vmem:[%s1689_s11 + $0x78] sm:$0x1] %vm453_vm2, %v906_v56 }
 0x281   : > { %1166 = vst.msk [vmem:[%s1689_s11 + $0x88] sm:$0x1] %vm453_vm2, %v940_v57 }
 0x284   : > { %v838_v58 = vpop.f32.mrf.mxu2  ;;  %v872_v59 = vpop.f32.mrf.mxu3 }
 0x285   : > { %1154 = vst.msk [vmem:[%s1680_s30 + $0x28] sm:$0x1] %vm453_vm2, %v838_v58 }
 0x286   : > { %1158 = vst.msk [vmem:[%s1689_s11 + $0x68] sm:$0x1] %vm453_vm2, %v872_v59 }
 0x287 PF: > { %p19_p4 = scmp.ge.s32.totalorder %s1576_s12, 4   ;;  %s1798_s21 = smov %s1446_s22 }
 0x288   : > { %s1799_s22 = smov %s1450_s23  ;;  %s1800_s23 = smov %s1587_s18 }
 0x289   : > { %s1801_s24 = smov %s1576_s12  ;;  %21 = sbr.rel (!%p19_p4) target bundleno = 5 (0x5), region = 120 }
 0x28e   :  { %989 = vsyncpa [#allocation3], 1 }
 0x28f   :  { %991 = vsyncpa [#allocation3 + $0x1], 1 }
 0x290   :  { %992 = vsyncpa [#allocation5], 1 }
 0x291   :  { %993 = vsyncpa [#allocation8], 1 }

</bundles_post_ra>
